<compile_context>
chip_gen: v6e
topology: v6e:2x2x1
jax: 0.10.0
libtpu: 0.0.40
codegen_flags: <defaults>
</compile_context>

<pallas_src>
import functools

import jax
import jax.numpy as jnp
from jax import lax
from jax.experimental import pallas as pl
from jax.experimental.pallas import tpu as pltpu

# ---- small, lane-friendly BERT config (hidden / intermediate multiples of 128) ----
VOCAB_SIZE = 512
TYPE_VOCAB_SIZE = 2
MAX_POS = 128
HIDDEN = 256
NUM_HEADS = 4
HEAD_DIM = HIDDEN // NUM_HEADS          # 64
INTERMEDIATE = 1024
NUM_LAYERS = 2
LN_EPS = 1e-12
NEG_INF = -1e9


def _ln(x, g, b):
    mu = jnp.mean(x, axis=-1, keepdims=True)
    c = x - mu
    var = jnp.mean(c * c, axis=-1, keepdims=True)
    return c * lax.rsqrt(var + LN_EPS) * g + b


def _bf16(x):
    return x.astype(jnp.bfloat16)


# --------------------------- embeddings: add + LayerNorm ---------------------------

def _embed_ln_kernel(we_ref, pe_ref, te_ref, g_ref, b_ref, o_ref):
    h = we_ref[...] + pe_ref[...] + te_ref[...]
    o_ref[...] = _ln(h, g_ref[...], b_ref[...]).astype(o_ref.dtype)


def embed_layernorm(we, pe, te, gamma, beta):
    """we/te: (B, S, H); pe: (S, H); gamma/beta: (1, H). Returns (B, S, H) f32."""
    B, S, H = we.shape
    return pl.pallas_call(
        _embed_ln_kernel,
        out_shape=jax.ShapeDtypeStruct((B, S, H), we.dtype),
        grid=(B,),
        in_specs=[
            pl.BlockSpec((None, S, H), lambda b: (b, 0, 0)),
            pl.BlockSpec((S, H), lambda b: (0, 0)),
            pl.BlockSpec((None, S, H), lambda b: (b, 0, 0)),
            pl.BlockSpec((1, H), lambda b: (0, 0)),
            pl.BlockSpec((1, H), lambda b: (0, 0)),
        ],
        out_specs=pl.BlockSpec((None, S, H), lambda b: (b, 0, 0)),
        compiler_params=pltpu.CompilerParams(dimension_semantics=("parallel",)),
    )(we, pe, te, gamma, beta)


# ------------------------ fully fused transformer layer ----------------------------

def _layer_kernel(h_ref, bias_ref,
                  qkv_w_ref, qkv_b_ref,
                  ao_w_ref, ao_b_ref, ln1_g_ref, ln1_b_ref,
                  fi_w_ref, fi_b_ref, fo_w_ref, fo_b_ref,
                  ln2_g_ref, ln2_b_ref,
                  o_ref, *, scale):
    h = h_ref[...]                                  # (S, H) f32
    bias = bias_ref[...]                            # (1, S) f32, precomputed mask bias

    # Fused QKV projection: bf16 MXU inputs, f32 accumulation.
    qkv = jnp.dot(_bf16(h), qkv_w_ref[...],
                  preferred_element_type=jnp.float32) + qkv_b_ref[...]   # (S, 3H)

    # All heads in one kernel invocation; heads split via static column slices,
    # context merged lane-dense to (S, H) so the final store is unmasked.
    ctx_heads = []
    for hd in range(NUM_HEADS):
        q = _bf16(qkv[:, hd * HEAD_DIM:(hd + 1) * HEAD_DIM])
        k = _bf16(qkv[:, HIDDEN + hd * HEAD_DIM:HIDDEN + (hd + 1) * HEAD_DIM])
        v = _bf16(qkv[:, 2 * HIDDEN + hd * HEAD_DIM:2 * HIDDEN + (hd + 1) * HEAD_DIM])
        s = lax.dot_general(q, k, (((1,), (1,)), ((), ())),
                            preferred_element_type=jnp.float32) * scale + bias
        # manual softmax; divide goes to the EUP via approximate reciprocal
        m = jnp.max(s, axis=-1, keepdims=True)
        e = jnp.exp(s - m)
        denom = jnp.sum(e, axis=-1, keepdims=True)
        p = e * pl.reciprocal(denom, approx=True)
        ctx_heads.append(jnp.dot(_bf16(p), v, preferred_element_type=jnp.float32))
    ctx = jnp.concatenate(ctx_heads, axis=-1)        # (S, H)

    attn_out = jnp.dot(_bf16(ctx), ao_w_ref[...],
                       preferred_element_type=jnp.float32) + ao_b_ref[...]
    h1 = _ln(h + attn_out, ln1_g_ref[...], ln1_b_ref[...])

    ffn = jax.nn.gelu(jnp.dot(_bf16(h1), fi_w_ref[...],
                              preferred_element_type=jnp.float32) + fi_b_ref[...],
                      approximate=True)
    ffn_out = jnp.dot(_bf16(ffn), fo_w_ref[...],
                      preferred_element_type=jnp.float32) + fo_b_ref[...]
    o_ref[...] = _ln(h1 + ffn_out, ln2_g_ref[...], ln2_b_ref[...]).astype(o_ref.dtype)


def transformer_layer(h, bias, lw, scale):
    """h: (B, S, H) f32; bias: (B, 1, S) f32; lw: prepared (bf16-weight) layer dict."""
    B, S, H = h.shape
    kernel = functools.partial(_layer_kernel, scale=scale)
    res = lambda b: (0, 0)   # weights/biases: VMEM-resident across grid steps
    return pl.pallas_call(
        kernel,
        out_shape=jax.ShapeDtypeStruct((B, S, H), h.dtype),
        grid=(B,),
        in_specs=[
            pl.BlockSpec((None, S, H), lambda b: (b, 0, 0)),   # activations (per batch)
            pl.BlockSpec((None, 1, S), lambda b: (b, 0, 0)),   # mask bias   (per batch)
            pl.BlockSpec((H, 3 * H), res),
            pl.BlockSpec((1, 3 * H), res),
            pl.BlockSpec((H, H), res),
            pl.BlockSpec((1, H), res),
            pl.BlockSpec((1, H), res),
            pl.BlockSpec((1, H), res),
            pl.BlockSpec((H, INTERMEDIATE), res),
            pl.BlockSpec((1, INTERMEDIATE), res),
            pl.BlockSpec((INTERMEDIATE, H), res),
            pl.BlockSpec((1, H), res),
            pl.BlockSpec((1, H), res),
            pl.BlockSpec((1, H), res),
        ],
        out_specs=pl.BlockSpec((None, S, H), lambda b: (b, 0, 0)),
        compiler_params=pltpu.CompilerParams(dimension_semantics=("parallel",)),
    )(h, bias,
      lw["qkv_w"], lw["qkv_b"],
      lw["ao_w"], lw["ao_b"], lw["ln1_g"], lw["ln1_b"],
      lw["fi_w"], lw["fi_b"], lw["fo_w"], lw["fo_b"],
      lw["ln2_g"], lw["ln2_b"])


# ------------------------------------ parameters -----------------------------------

def init_params(key):
    """init_bert_weights style: weights ~ N(0, 0.02), biases 0, LN gamma 1 (f32)."""
    keys = jax.random.split(key, 4 + NUM_LAYERS)

    def normal(k, shape):
        return 0.02 * jax.random.normal(k, shape, dtype=jnp.float32)

    params = {
        "word_emb": normal(keys[0], (VOCAB_SIZE, HIDDEN)),
        "pos_emb": normal(keys[1], (MAX_POS, HIDDEN)),
        "type_emb": normal(keys[2], (TYPE_VOCAB_SIZE, HIDDEN)),
        "emb_ln_g": jnp.ones((HIDDEN,), jnp.float32),
        "emb_ln_b": jnp.zeros((HIDDEN,), jnp.float32),
        "pool_w": normal(keys[3], (HIDDEN, HIDDEN)),   # stored (in, out): no per-call .T
        "pool_b": jnp.zeros((HIDDEN,), jnp.float32),
        "layers": [],
    }
    for l in range(NUM_LAYERS):
        lk = jax.random.split(keys[4 + l], 4)
        params["layers"].append({
            "qkv_w": normal(lk[0], (HIDDEN, 3 * HIDDEN)),
            "qkv_b": jnp.zeros((3 * HIDDEN,), jnp.float32),
            "ao_w": normal(lk[1], (HIDDEN, HIDDEN)),
            "ao_b": jnp.zeros((HIDDEN,), jnp.float32),
            "ln1_g": jnp.ones((HIDDEN,), jnp.float32),
            "ln1_b": jnp.zeros((HIDDEN,), jnp.float32),
            "fi_w": normal(lk[2], (HIDDEN, INTERMEDIATE)),
            "fi_b": jnp.zeros((INTERMEDIATE,), jnp.float32),
            "fo_w": normal(lk[3], (INTERMEDIATE, HIDDEN)),
            "fo_b": jnp.zeros((HIDDEN,), jnp.float32),
            "ln2_g": jnp.ones((HIDDEN,), jnp.float32),
            "ln2_b": jnp.zeros((HIDDEN,), jnp.float32),
        })
    return params


def prepare_params(params):
    """One-time prep: matmul weights -> bf16 (single-pass MXU, half the DMA bytes),
    biases / LN params -> (1, N) rows for 2-D lane-aligned VMEM residency."""
    row = lambda v: v.reshape(1, -1)
    prep = {
        "word_emb": params["word_emb"],
        "pos_emb": params["pos_emb"],
        "type_emb": params["type_emb"],
        "emb_ln_g": row(params["emb_ln_g"]),
        "emb_ln_b": row(params["emb_ln_b"]),
        "pool_w": params["pool_w"].astype(jnp.bfloat16),
        "pool_b": params["pool_b"],
        "layers": [],
    }
    for l in params["layers"]:
        prep["layers"].append({
            "qkv_w": l["qkv_w"].astype(jnp.bfloat16), "qkv_b": row(l["qkv_b"]),
            "ao_w": l["ao_w"].astype(jnp.bfloat16),   "ao_b": row(l["ao_b"]),
            "ln1_g": row(l["ln1_g"]),                 "ln1_b": row(l["ln1_b"]),
            "fi_w": l["fi_w"].astype(jnp.bfloat16),   "fi_b": row(l["fi_b"]),
            "fo_w": l["fo_w"].astype(jnp.bfloat16),   "fo_b": row(l["fo_b"]),
            "ln2_g": row(l["ln2_g"]),                 "ln2_b": row(l["ln2_b"]),
        })
    return prep


# ------------------------------------- forward --------------------------------------

def bert_encoder_forward(prep, input_ids, mask=None, segment=None):
    """Pallas BertEncoder.forward (param.cls == 1): returns pooled CLS feature (B, H)."""
    B, S = input_ids.shape
    if mask is None:
        mask = jnp.ones((B, S), jnp.float32)
    mask = mask.astype(jnp.float32)
    if segment is None:
        segment = jnp.zeros((B, S), jnp.int32)

    # TODO(synk): embedding lookups are plain-JAX gathers (no clean rectangular BlockSpec).
    we = jnp.take(prep["word_emb"], input_ids, axis=0)      # (B, S, H)
    pe = prep["pos_emb"][:S]                                # (S, H)
    te = jnp.take(prep["type_emb"], segment, axis=0)        # (B, S, H)

    h = embed_layernorm(we, pe, te, prep["emb_ln_g"], prep["emb_ln_b"])   # (B, S, H)

    # additive key-side mask bias, hoisted out of the attention kernel
    bias = ((1.0 - mask) * NEG_INF).reshape(B, 1, S)

    scale = 1.0 / (HEAD_DIM ** 0.5)
    for lw in prep["layers"]:
        h = transformer_layer(h, bias, lw, scale)

    # Pooler: tiny (B, H) x (H, H) Linear + tanh -> plain JAX (no kernel dispatch).
    cls_tok = h[:, 0, :]
    pooled = jnp.tanh(
        jnp.dot(cls_tok.astype(jnp.bfloat16), prep["pool_w"],
                preferred_element_type=jnp.float32) + prep["pool_b"])
    return pooled


# -------------------------------- plain-JAX reference --------------------------------

def _reference_forward(params, input_ids, mask, segment):
    """XLA reference with the same bf16-input / f32-accumulation matmul precision."""
    B, S = input_ids.shape
    mask = mask.astype(jnp.float32)

    def bdot(a, b):
        return jnp.dot(a.astype(jnp.bfloat16), b.astype(jnp.bfloat16),
                       preferred_element_type=jnp.float32)

    we = jnp.take(params["word_emb"], input_ids, axis=0)
    pe = params["pos_emb"][:S][None]
    te = jnp.take(params["type_emb"], segment, axis=0)
    h = _ln(we + pe + te, params["emb_ln_g"], params["emb_ln_b"])

    scale = 1.0 / (HEAD_DIM ** 0.5)
    bias = (1.0 - mask)[:, None, None, :] * NEG_INF
    for layer in params["layers"]:
        qkv = bdot(h.reshape(B * S, HIDDEN), layer["qkv_w"]) + layer["qkv_b"]
        qkv = qkv.reshape(B, S, 3, NUM_HEADS, HEAD_DIM)
        q = qkv[:, :, 0].transpose(0, 2, 1, 3)
        k = qkv[:, :, 1].transpose(0, 2, 1, 3)
        v = qkv[:, :, 2].transpose(0, 2, 1, 3)
        s = jnp.einsum("bhqd,bhkd->bhqk", q.astype(jnp.bfloat16),
                       k.astype(jnp.bfloat16),
                       preferred_element_type=jnp.float32) * scale + bias
        p = jax.nn.softmax(s, axis=-1)
        ctx = jnp.einsum("bhqk,bhkd->bhqd", p.astype(jnp.bfloat16),
                         v.astype(jnp.bfloat16),
                         preferred_element_type=jnp.float32)
        ctx = ctx.transpose(0, 2, 1, 3).reshape(B * S, HIDDEN)
        attn_out = (bdot(ctx, layer["ao_w"]) + layer["ao_b"]).reshape(B, S, HIDDEN)
        h = _ln(h + attn_out, layer["ln1_g"], layer["ln1_b"])
        ffn = jax.nn.gelu(bdot(h.reshape(B * S, HIDDEN), layer["fi_w"]) + layer["fi_b"],
                          approximate=True)
        ffn_out = (bdot(ffn, layer["fo_w"]) + layer["fo_b"]).reshape(B, S, HIDDEN)
        h = _ln(h + ffn_out, layer["ln2_g"], layer["ln2_b"])

    cls_tok = h[:, 0]
    return jnp.tanh(bdot(cls_tok, params["pool_w"]) + params["pool_b"])


if __name__ == "__main__":
    key = jax.random.PRNGKey(0)
    k_params, k_ids = jax.random.split(key)

    B, S = 2, 128
    params = init_params(k_params)
    prep = prepare_params(params)
    input_ids = jax.random.randint(k_ids, (B, S), 0, VOCAB_SIZE, dtype=jnp.int32)
    # second example has 32 padded positions to exercise the attention mask
    mask = jnp.ones((B, S), jnp.float32).at[1, S - 32:].set(0.0)
    segment = jnp.zeros((B, S), jnp.int32)

    pooled = bert_encoder_forward(prep, input_ids, mask, segment)
    jax.block_until_ready(pooled)

    ref = _reference_forward(params, input_ids, mask, segment)
    assert pooled.shape == (B, HIDDEN)
    err = float(jnp.max(jnp.abs(pooled - ref)))
    assert jnp.allclose(pooled, ref, atol=2e-2, rtol=2e-2), err

    print("KERNEL_OK")
</pallas_src>

<mosaic_0001>
module attributes {stable_mosaic.version = 11 : i64} {
  func.func @_embed_ln_kernel(%arg0: i32, %arg1: memref<1x128x256xf32, #tpu.memory_space<vmem>>, %arg2: memref<128x256xf32, #tpu.memory_space<vmem>>, %arg3: memref<1x128x256xf32, #tpu.memory_space<vmem>>, %arg4: memref<1x256xf32, #tpu.memory_space<vmem>>, %arg5: memref<1x256xf32, #tpu.memory_space<vmem>>, %arg6: memref<1x128x256xf32, #tpu.memory_space<vmem>>) attributes {dimension_semantics = [#tpu.dimension_semantics<parallel>], iteration_bounds = array<i64: 2>, scalar_prefetch = 0 : i64, scratch_operands = 0 : i64, tpu.core_type = #tpu.core_type<tc>, window_params = [{transform_indices = @transform_0, window_bounds = array<i64: 1, 128, 256>}, {pipeline_mode = #tpu.pipeline_mode<synchronous>, transform_indices = @transform_1, window_bounds = array<i64: 128, 256>}, {transform_indices = @transform_2, window_bounds = array<i64: 1, 128, 256>}, {pipeline_mode = #tpu.pipeline_mode<synchronous>, transform_indices = @transform_3, window_bounds = array<i64: 1, 256>}, {pipeline_mode = #tpu.pipeline_mode<synchronous>, transform_indices = @transform_4, window_bounds = array<i64: 1, 256>}, {transform_indices = @transform_5, window_bounds = array<i64: 1, 128, 256>}]} {
    %c0 = arith.constant 0 : index
    %c0_0 = arith.constant 0 : index
    %c0_1 = arith.constant 0 : index
    %0 = vector.load %arg1[%c0, %c0_0, %c0_1] : memref<1x128x256xf32, #tpu.memory_space<vmem>>, vector<1x128x256xf32>
    %1 = vector.shape_cast %0 : vector<1x128x256xf32> to vector<128x256xf32>
    %c0_2 = arith.constant 0 : index
    %c0_3 = arith.constant 0 : index
    %2 = vector.load %arg2[%c0_2, %c0_3] : memref<128x256xf32, #tpu.memory_space<vmem>>, vector<128x256xf32>
    %3 = arith.addf %1, %2 : vector<128x256xf32>
    %c0_4 = arith.constant 0 : index
    %c0_5 = arith.constant 0 : index
    %c0_6 = arith.constant 0 : index
    %4 = vector.load %arg3[%c0_4, %c0_5, %c0_6] : memref<1x128x256xf32, #tpu.memory_space<vmem>>, vector<1x128x256xf32>
    %5 = vector.shape_cast %4 : vector<1x128x256xf32> to vector<128x256xf32>
    %6 = arith.addf %3, %5 : vector<128x256xf32>
    %c0_7 = arith.constant 0 : index
    %c0_8 = arith.constant 0 : index
    %7 = vector.load %arg4[%c0_7, %c0_8] : memref<1x256xf32, #tpu.memory_space<vmem>>, vector<1x256xf32>
    %c0_9 = arith.constant 0 : index
    %c0_10 = arith.constant 0 : index
    %8 = vector.load %arg5[%c0_9, %c0_10] : memref<1x256xf32, #tpu.memory_space<vmem>>, vector<1x256xf32>
    %cst = arith.constant dense<0.000000e+00> : vector<128xf32>
    %9 = vector.multi_reduction <add>, %6, %cst [1] : vector<128x256xf32> to vector<128xf32>
    %10 = vector.shape_cast %9 : vector<128xf32> to vector<128x1xf32>
    %cst_11 = arith.constant 2.560000e+02 : f32
    %11 = vector.broadcast %cst_11 : f32 to vector<128x1xf32>
    %12 = arith.divf %10, %11 : vector<128x1xf32>
    %13 = vector.broadcast %12 : vector<128x1xf32> to vector<128x256xf32>
    %14 = arith.subf %6, %13 : vector<128x256xf32>
    %15 = arith.mulf %14, %14 : vector<128x256xf32>
    %cst_12 = arith.constant dense<0.000000e+00> : vector<128xf32>
    %16 = vector.multi_reduction <add>, %15, %cst_12 [1] : vector<128x256xf32> to vector<128xf32>
    %17 = vector.shape_cast %16 : vector<128xf32> to vector<128x1xf32>
    %cst_13 = arith.constant 2.560000e+02 : f32
    %18 = vector.broadcast %cst_13 : f32 to vector<128x1xf32>
    %19 = arith.divf %17, %18 : vector<128x1xf32>
    %cst_14 = arith.constant 9.99999996E-13 : f32
    %20 = vector.broadcast %cst_14 : f32 to vector<128x1xf32>
    %21 = arith.addf %19, %20 : vector<128x1xf32>
    %22 = math.rsqrt %21 : vector<128x1xf32>
    %23 = vector.broadcast %22 : vector<128x1xf32> to vector<128x256xf32>
    %24 = arith.mulf %14, %23 : vector<128x256xf32>
    %25 = vector.broadcast %7 : vector<1x256xf32> to vector<128x256xf32>
    %26 = arith.mulf %24, %25 : vector<128x256xf32>
    %27 = vector.broadcast %8 : vector<1x256xf32> to vector<128x256xf32>
    %28 = arith.addf %26, %27 : vector<128x256xf32>
    %c0_15 = arith.constant 0 : index
    %c0_16 = arith.constant 0 : index
    %c0_17 = arith.constant 0 : index
    %29 = vector.load %arg6[%c0_15, %c0_16, %c0_17] : memref<1x128x256xf32, #tpu.memory_space<vmem>>, vector<1x128x256xf32>
    %30 = vector.shape_cast %29 : vector<1x128x256xf32> to vector<128x256xf32>
    %31 = vector.shape_cast %28 : vector<128x256xf32> to vector<1x128x256xf32>
    tpu.vector_store %arg6[%c0_15, %c0_16, %c0_17], %31 {strides = array<i32>} : memref<1x128x256xf32, #tpu.memory_space<vmem>>, vector<1x128x256xf32>,
    return
  }
  func.func @transform_0(%arg0: i32) -> (i32, i32, i32) {
    %c0_i32 = arith.constant 0 : i32
    %c0_i32_0 = arith.constant 0 : i32
    %c0_i32_1 = arith.constant 0 : i32
    return %arg0, %c0_i32, %c0_i32_0 : i32, i32, i32
  }
  func.func @transform_1(%arg0: i32) -> (i32, i32) {
    %c0_i32 = arith.constant 0 : i32
    %c0_i32_0 = arith.constant 0 : i32
    %c0_i32_1 = arith.constant 0 : i32
    return %c0_i32, %c0_i32_0 : i32, i32
  }
  func.func @transform_2(%arg0: i32) -> (i32, i32, i32) {
    %c0_i32 = arith.constant 0 : i32
    %c0_i32_0 = arith.constant 0 : i32
    %c0_i32_1 = arith.constant 0 : i32
    return %arg0, %c0_i32, %c0_i32_0 : i32, i32, i32
  }
  func.func @transform_3(%arg0: i32) -> (i32, i32) {
    %c0_i32 = arith.constant 0 : i32
    %c0_i32_0 = arith.constant 0 : i32
    %c0_i32_1 = arith.constant 0 : i32
    return %c0_i32, %c0_i32_0 : i32, i32
  }
  func.func @transform_4(%arg0: i32) -> (i32, i32) {
    %c0_i32 = arith.constant 0 : i32
    %c0_i32_0 = arith.constant 0 : i32
    %c0_i32_1 = arith.constant 0 : i32
    return %c0_i32, %c0_i32_0 : i32, i32
  }
  func.func @transform_5(%arg0: i32) -> (i32, i32, i32) {
    %c0_i32 = arith.constant 0 : i32
    %c0_i32_0 = arith.constant 0 : i32
    %c0_i32_1 = arith.constant 0 : i32
    return %arg0, %c0_i32, %c0_i32_0 : i32, i32, i32
  }
}

</mosaic_0001>

<bundles_post_ra>
// kernel: tpu_custom_call.1
= control target key start
LH: loop header
LB: loop body
LE: loop exit
PB: predicated region body
PF: predicated region fallthrough
CT: control target
= control target key end

     0   :  { %10 = vsyncpa [#allocation3], 0  ;;  %s1976_s0 = inlined_call_operand.hbm [shape: f32[2,128,256], index: 0, kind: input, shape index: {}]   ;;  %s1977_s1 = inlined_call_operand.hbm [shape: f32[128,256], index: 1, kind: input, shape index: {}]   ;;  %s1978_s2 = inlined_call_operand.hbm [shape: f32[2,128,256], index: 2, kind: input, shape index: {}]   ;;  %s1979_s3 = inlined_call_operand.vmem [shape: f32[1,256], index: 3, kind: input, shape index: {}]   ;;  %s1980_s4 = inlined_call_operand.vmem [shape: f32[1,256], index: 4, kind: input, shape index: {}]   ;;  %s1981_s5 = inlined_call_operand.hbm [shape: f32[2,128,256], index: 5, kind: output, shape index: {}]  }
   0x1   :  { %12 = vsyncpa [#allocation3 + $0x1], 0 }
   0x2   :  { %13 = vsyncpa [#allocation6], 0 }
   0x3   :  { %14 = vsyncpa [#allocation4], 0 }
   0x4   :  { %16 = vsyncpa [#allocation4 + $0x1], 0  ;;  %s1264_s18 = smov 0   ;;  %s1266_s19 = smov 0  }
   0x5   :  { %s1268_s20 = smov 0   ;;  %s1270_s21 = smov 0  }
   0x6 LB: > { %s1285_s22 = sadd.s32 1, %s1224_s21   ;;  %s29_s23 = sadd.s32 1, %s1220_s20  ;;  %s1224_s21 = sphi %s1270_s21, %s2004_s21   ;;  %s1220_s20 = sphi %s1268_s20, %s2003_s20   ;;  %s1216_s19 = sphi %s1266_s19, %s2002_s19   ;;  %s1212_s18 = sphi %s1264_s18, %s2001_s18  }
   0x7   : > { %s26_s24 = ssub.s32 %s1224_s21, %s1285_s22  ;;  %p36_p0 = scmp.ne.s32.totalorder %s1220_s20, %s1216_s19 }
   0x8   : > { %p27_p1 = scmp.eq.s32.totalorder %s26_s24, 0  ;;  %p37_p2 = scmp.eq.s32.totalorder %s1224_s21, 0 }
   0x9   : > { %p998_p5 = scmp.lt.s32.totalorder %s1224_s21, 2  ;;  %s200_s26 = sand.u32 1, %s1224_s21  }
   0xa   : > { %s1294_s25 = scalar_select %p27_p1, %s1220_s20, %s29_s23  }
   0xb   : > { %p38_p3 = por %p37_p2, %p36_p0  ;;  %s202_s27 = sand.u32 1, %s1220_s20  }
   0xc   : > { %s1303_s28 = sshll.u32 %s202_s27, 8  ;;  %s969_s29 = sshll.u32 %s1224_s21, 12 }
   0xd   : > { %s1311_s7 = scalar_lea.hbm %s1976_s0, %s969_s29  ;;  %s204_s8 = scalar_lea.vmem [#allocation2], %s1303_s28 }
   0xe   : > { %s211_s9 = sshll.u32 %s204_s8, 4  ;;  %p1314_p6 = pnand %p998_p5, %p38_p3  ;;  %s1318_s9 = int_to_ptr.vmem [resolvable:$true] %s211_s9 }
   0xf   : > { %s1320_s11 = scalar_lea.sflag [#allocation3], %s200_s26  ;;  %s1070_s12 = scalar_lea.hbm %s1311_s7, 4096 }
  0x10   : > { %p1071_p7 = scmp.ne.s32.totalorder %s1311_s7, %s1070_s12  ;;  %p1072_p8 = pneg %p1314_p6 }
  0x11   : > { %s1075_s15 = scalar_lea.hbm %s1976_s0, 8192  ;;  %p1076_p11 = scmp.lt.s32.totalorder %s1311_s7, %s1976_s0 }
  0x12   : > { %p1073_p9 = pnand %p1072_p8, %p1071_p7  ;;  %p1077_p12 = scmp.lt.s32.totalorder %s1075_s15, %s1070_s12 }
  0x14   : > { %p1074_p10 = pneg %p1073_p9  ;;  %p1078_p13 = por %p1077_p12, %p1076_p11 }
  0x16   : > { %p1079_p1 = pnand %p1078_p13, %p1074_p10 }
  0x18   : > { %1082 = shalt.err (!%p1079_p1)
}
  0x19   : > { %s1083_s23 = scalar_lea.vmem %s1318_s9, 4096  ;;  %s1226_s24 = smov [#allocation2]  }
  0x1a   : > { %p1084_p2 = scmp.ne.s32.totalorder %s1318_s9, %s1083_s23  ;;  %s1088_s26 = sshll.u32 %s1226_s24, 4  ;;  %s1089_s26 = int_to_ptr.vmem [resolvable:$false] %s1088_s26 }
  0x1b   : > { %s1090_s27 = scalar_lea.vmem %s1089_s26, 8192  ;;  %p1091_p7 = scmp.lt.s32.totalorder %s1318_s9, %s1089_s26 }
  0x1c   : > { %p1086_p3 = pnand %p1084_p2, %p1072_p8  ;;  %p1092_p9 = scmp.lt.s32.totalorder %s1090_s27, %s1083_s23 }
  0x1e   : > { %p1087_p5 = pneg %p1086_p3  ;;  %p1093_p4 = por %p1092_p9, %p1091_p7 }
  0x20   : > { %p1094_p11 = pnand %p1093_p4, %p1087_p5 }
  0x22   : > { %1097 = shalt.err (!%p1094_p11)
}
  0x23   : > { %s1983_s30 = smov 256   ;;  %s1228_s6 = smov 16  }
  0x24   : > { %989 = dma.hbm_to_vmem [thread:$0]  (!%p1314_p6), %s1311_s7, 4096, %s1318_s9, %s1320_s11, %s1983_s30, %s1983_s30, %s1228_s6  }
  0x25   : > { %s225_s8 = scalar_lea.vmem [#allocation7], %s1303_s28  ;;  %s1352_s13 = sadd.s32 4294967295, %s1224_s21  }
  0x26   : > { %s232_s12 = sshll.u32 %s225_s8, 4  ;;  %s949_s14 = sadd.s32 4294967294, %s1224_s21   ;;  %s1385_s12 = int_to_ptr.vmem [resolvable:$true] %s232_s12 }
  0x27   : > { %p42_p4 = scmp.ne.s32.totalorder %s1216_s19, %s1212_s18  ;;  %p1982_p10 = scmp.eq.s32.totalorder %s1352_s13, 0 }
  0x28   : > { %p155_p12 = scmp.eq.s32.totalorder %s1352_s13, 1  ;;  %p161_p13 = scmp.eq.s32.totalorder %s949_s14, 1 }
  0x29   : > { %p1361_p1 = por %p1982_p10, %p42_p4  ;;  %p950_p2 = scmp.ge.s32.totalorder %s1224_s21, 1 }
  0x2a   : > { %p1369_p3 = por %p155_p12, %p36_p0  ;;  %p1373_p5 = por %p161_p13, %p42_p4 }
  0x2b   : > { %s1988_s15 = scalar_select %p1361_p1, 1, 0 }
  0x2c   : > { %s1989_s28 = scalar_select %p1369_p3, 1, 0 }
  0x2d   : > { %s1990_s7 = scalar_select %p1373_p5, 1, 0 }
  0x2e   : > { %p168_p7 = scmp.lt.s32.totalorder %s1224_s21, 3  ;;  %s1383_s17 = scalar_lea.hbm %s1978_s2, %s969_s29 }
  0x2f   : > { %s1229_s24 = smov [#allocation5]   ;;  %s1098_s27 = scalar_lea.hbm %s1383_s17, 4096 }
  0x30   : > { %p1387_p0 = pnand %p950_p2, %p168_p7  ;;  %s1391_s26 = sshll.u32 %s1229_s24, 4  ;;  %s181_s26 = int_to_ptr.vmem [resolvable:$true] %s1391_s26 }
  0x31   : > { %p1099_p11 = scmp.ne.s32.totalorder %s1383_s17, %s1098_s27  ;;  %s1103_s14 = scalar_lea.hbm %s1978_s2, 8192 }
  0x32   : > { %p1104_p13 = scmp.lt.s32.totalorder %s1383_s17, %s1978_s2  ;;  %p1105_p2 = scmp.lt.s32.totalorder %s1103_s14, %s1098_s27 }
  0x33   : > { %p1101_p4 = pnand %p1099_p11, %p1072_p8 }
  0x34   : > { %p1106_p7 = por %p1105_p2, %p1104_p13 }
  0x35   : > { %p1102_p12 = pneg %p1101_p4 }
  0x37   : > { %p1107_p10 = pnand %p1106_p7, %p1102_p12 }
  0x39   : > { %1110 = shalt.err (!%p1107_p10)
}
  0x3a   : > { %s1111_s24 = scalar_lea.vmem %s1385_s12, 4096  ;;  %s1230_s29 = smov [#allocation7]  }
  0x3b   : > { %p1112_p9 = scmp.ne.s32.totalorder %s1385_s12, %s1111_s24  ;;  %s1116_s8 = sshll.u32 %s1230_s29, 4  ;;  %s1117_s8 = int_to_ptr.vmem [resolvable:$false] %s1116_s8 }
  0x3c   : > { %s1118_s30 = scalar_lea.vmem %s1117_s8, 8192  ;;  %p1119_p5 = scmp.lt.s32.totalorder %s1385_s12, %s1117_s8 }
  0x3d   : > { %p1114_p11 = pnand %p1112_p9, %p1072_p8  ;;  %p1120_p3 = scmp.lt.s32.totalorder %s1118_s30, %s1111_s24 }
  0x3f   : > { %p1115_p4 = pneg %p1114_p11  ;;  %p1121_p1 = por %p1120_p3, %p1119_p5 }
  0x41   : > { %p1122_p13 = pnand %p1121_p1, %p1115_p4 }
  0x43   : > { %1125 = shalt.err (!%p1122_p13)
}
  0x44   : > { %s1992_s27 = smov 256   ;;  %p1993_p8 = scmp.eq.s32.totalorder %s1352_s13, 0 }
  0x45   : > { %992 = dma.hbm_to_vmem [thread:$0]  (!%p1314_p6), %s1383_s17, 4096, %s1385_s12, %s1320_s11, %s1992_s27, %s1992_s27, %s1228_s6  }
  0x46   : > { %p1994_p10 = pneg %p1387_p0  ;;  %s1137_s30 = scalar_lea.vmem %s181_s26, 4096 }
  0x47   : > { %p1138_p1 = scmp.ne.s32.totalorder %s181_s26, %s1137_s30  ;;  %p1145_p2 = scmp.lt.s32.totalorder %s181_s26, %s181_s26 }
  0x48   : > { %p983_p9 = pnand %p1994_p10, %p1993_p8  ;;  %p1146_p7 = scmp.lt.s32.totalorder %s1137_s30, %s1137_s30 }
  0x4a   : > { %p1128_p3 = pneg %p983_p9  ;;  %p1147_p11 = por %p1146_p7, %p1145_p2 }
  0x4c   : > { %p1140_p5 = pnand %p1138_p1, %p1128_p3 }
  0x4e   : > { %p1141_p12 = pneg %p1140_p5 }
  0x50   : > { %p1148_p4 = pnand %p1147_p11, %p1141_p12 }
  0x52   : > { %1151 = shalt.err (!%p1148_p4)
}
  0x53   : > { %985 = dma.hbm_to_vmem [thread:$0]  (!%p983_p9), %s1977_s1, 4096, %s181_s26, [#allocation6], %s1992_s27, %s1992_s27, %s1228_s6  }
  0x54   : > { %244 = sbr.rel (%p1387_p0) target bundleno = 464 (0x1d0), region = 40  ;;  %s246_s12 = sand.u32 (!%p1387_p0), 1, %s1352_s13  }
  0x55   : > { %s248_s17 = sand.u32 (!%p1387_p0), 1, %s1216_s19   ;;  %s247_s9 = scalar_lea.sflag (!%p1387_p0), [#allocation3], %s246_s12 }
  0x56   : > { %s1439_s14 = sshll.u32 (!%p1387_p0), %s248_s17, 8  ;;  %p1995_p6 = scmp.ne.s32.totalorder (!%p1387_p0), %s1988_s15, 0 }
  0x57   : > { %s1442_s16 = scalar_lea.vmem (!%p1387_p0), [#allocation2], %s1439_s14 }
  0x59   : > { %1195 = dma.done.wait (%p1995_p6), %s247_s9, 4096  }
  0x5a   : > { %1197 = vsyncadd (%p1995_p6), %s247_s9, 4294963200  ;;  %p1996_p0 = scmp.eq.s32.totalorder %s1352_s13, 0 }
  0x5c   : > { %1199 = dma.done.wait (%p1996_p0), [#allocation6], 4096   ;;  %p1997_p13 = pmov %p1996_p0 }
  0x5d   : > { %s1453_s6 = scalar_lea.vmem [#allocation7], %s1439_s14 }
  0x5e   : > { %1201 = vsyncadd (%p1997_p13), [#allocation6], 4294963200 }
  0x5f   : > { %1203 = dma.done.wait (%p1995_p6), %s247_s9, 4096  }
  0x60   : > { %1205 = vsyncadd (%p1995_p6), %s247_s9, 4294963200  ;;  %v295_v0 = vld [vmem:[%s1442_s16] sm:$0xff]  ;;  %v296_v1 = vld [vmem:[%s1442_s16 + $0x8] sm:$0xff]  ;;  %s1804_s29 = scalar_lea.vmem [#allocation8], %s1439_s14  ;;  %s971_s8 = sshll.u32 %s1352_s13, 12 }
  0x61   : > { %v327_v2 = vld [vmem:[#allocation5] sm:$0xff]  ;;  %v328_v3 = vld [vmem:[#allocation5 + $0x8] sm:$0xff]  ;;  %v297_v18 = vld [vmem:[%s1442_s16 + $0x10] sm:$0xff]  ;;  %s846_s27 = sshll.u32 %s1804_s29, 4  ;;  %s1925_s11 = scalar_lea.hbm %s1981_s5, %s971_s8  ;;  %s1927_s27 = int_to_ptr.vmem [resolvable:$true] %s846_s27 }
  0x62   : > { %v359_v4 = vadd.f32 %v327_v2, %v295_v0  ;;  %v391_v5 = vld [vmem:[%s1453_s6] sm:$0xff]  ;;  %v392_v6 = vld [vmem:[%s1453_s6 + $0x8] sm:$0xff]  ;;  %v360_v7 = vadd.f32 %v328_v3, %v296_v1  ;;  %v298_v19 = vld [vmem:[%s1442_s16 + $0x18] sm:$0xff]  ;;  %s1935_s13 = scalar_lea.sflag [#allocation4], %s248_s17  ;;  %s1152_s12 = scalar_lea.vmem %s1927_s27, 4096 }
  0x63   : > { %v299_v8 = vld [vmem:[%s1442_s16 + $0x20] sm:$0xff]  ;;  %v300_v9 = vld [vmem:[%s1442_s16 + $0x28] sm:$0xff]  ;;  %v329_v20 = vld [vmem:[#allocation5 + $0x10] sm:$0xff]  ;;  %p1153_p8 = scmp.ne.s32.totalorder %s1927_s27, %s1152_s12  ;;  %p1998_p10 = scmp.ne.s32.totalorder %s1989_s28, 0 }
  0x64   : > { %v331_v10 = vld [vmem:[#allocation5 + $0x20] sm:$0xff]  ;;  %v1465_v11 = vadd.f32 %v391_v5, %v359_v4  ;;  %v332_v12 = vld [vmem:[#allocation5 + $0x28] sm:$0xff]  ;;  %v1469_v16 = vadd.f32 %v392_v6, %v360_v7  ;;  %v330_v22 = vld [vmem:[#allocation5 + $0x18] sm:$0xff]  ;;  %v361_v23 = vadd.f32 %v329_v20, %v297_v18  ;;  %s1231_s14 = smov [#allocation8]  }
  0x65   : > { %v363_v13 = vadd.f32 %v331_v10, %v299_v8  ;;  %v395_v14 = vld [vmem:[%s1453_s6 + $0x20] sm:$0xff]  ;;  %v396_v15 = vld [vmem:[%s1453_s6 + $0x28] sm:$0xff]  ;;  %v364_v17 = vadd.f32 %v332_v12, %v300_v9  ;;  %v393_v24 = vld [vmem:[%s1453_s6 + $0x10] sm:$0xff]  ;;  %v362_v28 = vadd.f32 %v330_v22, %v298_v19  ;;  %p1154_p9 = pnand %p1153_p8, %p1998_p10  ;;  %s1156_s9 = sshll.u32 %s1231_s14, 4  ;;  %s1157_s9 = int_to_ptr.vmem [resolvable:$false] %s1156_s9 }
  0x66   : > { %v394_v25 = vld [vmem:[%s1453_s6 + $0x18] sm:$0xff]  ;;  %v457_v26 = vadd.f32 %v1469_v16, %v1465_v11  ;;  %v301_v29 = vld [vmem:[%s1442_s16 + $0x30] sm:$0xff]  ;;  %v1483_v32 = vadd.f32 %v393_v24, %v361_v23  ;;  %v303_v40 = vld [vmem:[%s1442_s16 + $0x40] sm:$0xff]  ;;  %p1159_p1 = scmp.lt.s32.totalorder %s1927_s27, %s1157_s9 }
  0x67   : > { %v1473_v21 = vadd.f32 %v395_v14, %v363_v13  ;;  %v1479_v27 = vadd.f32 %v396_v15, %v364_v17  ;;  %v302_v30 = vld [vmem:[%s1442_s16 + $0x38] sm:$0xff]  ;;  %v333_v31 = vld [vmem:[#allocation5 + $0x30] sm:$0xff]  ;;  %v1489_v38 = vadd.f32 %v394_v25, %v362_v28  ;;  %v304_v41 = vld [vmem:[%s1442_s16 + $0x48] sm:$0xff]  ;;  %p1155_p3 = pneg %p1154_p9 }
  0x68   : > { %v334_v33 = vld [vmem:[#allocation5 + $0x38] sm:$0xff]  ;;  %v365_v34 = vadd.f32 %v333_v31, %v301_v29  ;;  %v397_v35 = vld [vmem:[%s1453_s6 + $0x30] sm:$0xff]  ;;  %458 = vadd.xlane.f32.xlu0 %v457_v26  ;;  %v335_v42 = vld [vmem:[#allocation5 + $0x40] sm:$0xff] }
  0x69   : > { %v398_v36 = vld [vmem:[%s1453_s6 + $0x38] sm:$0xff]  ;;  %v463_v37 = vadd.f32 %v1479_v27, %v1473_v21  ;;  %v366_v39 = vadd.f32 %v334_v33, %v302_v30  ;;  %v336_v44 = vld [vmem:[#allocation5 + $0x48] sm:$0xff]  ;;  %v367_v45 = vadd.f32 %v335_v42, %v303_v40  ;;  %v399_v46 = vld [vmem:[%s1453_s6 + $0x40] sm:$0xff]  ;;  %v460_v48 = vadd.f32 %v1489_v38, %v1483_v32 }
  0x6a   : > { %v1493_v43 = vadd.f32 %v397_v35, %v365_v34  ;;  %v400_v47 = vld [vmem:[%s1453_s6 + $0x48] sm:$0xff]  ;;  %v368_v50 = vadd.f32 %v336_v44, %v304_v41  ;;  %v305_v51 = vld [vmem:[%s1442_s16 + $0x50] sm:$0xff]  ;;  %v306_v52 = vld [vmem:[%s1442_s16 + $0x58] sm:$0xff] }
  0x6b   : > { %464 = vadd.xlane.f32.xlu1 %v463_v37  ;;  %v1499_v49 = vadd.f32 %v398_v36, %v366_v39  ;;  %v337_v53 = vld [vmem:[#allocation5 + $0x50] sm:$0xff]  ;;  %v1503_v54 = vadd.f32 %v399_v46, %v367_v45  ;;  %v338_v55 = vld [vmem:[#allocation5 + $0x58] sm:$0xff]  ;;  %v307_v62 = vld [vmem:[%s1442_s16 + $0x60] sm:$0xff] }
  0x6c   : > { %v369_v56 = vadd.f32 %v337_v53, %v305_v51  ;;  %v401_v57 = vld [vmem:[%s1453_s6 + $0x50] sm:$0xff]  ;;  %v402_v58 = vld [vmem:[%s1453_s6 + $0x58] sm:$0xff]  ;;  %461 = vadd.xlane.f32.xlu0 %v460_v48  ;;  %v1509_v60 = vadd.f32 %v400_v47, %v368_v50  ;;  %v370_v61 = vadd.f32 %v338_v55, %v306_v52  ;;  %v308_v63 = vld [vmem:[%s1442_s16 + $0x68] sm:$0xff] }
  0x6d   : > { %v466_v59 = vadd.f32 %v1499_v49, %v1493_v43  ;;  %v339_v0 = vld [vmem:[#allocation5 + $0x60] sm:$0xff]  ;;  %v340_v2 = vld [vmem:[#allocation5 + $0x68] sm:$0xff]  ;;  %v309_v9 = vld [vmem:[%s1442_s16 + $0x70] sm:$0xff] }
  0x6e   : > { %v1513_v1 = vadd.f32 %v401_v57, %v369_v56  ;;  %v371_v3 = vadd.f32 %v339_v0, %v307_v62  ;;  %v403_v4 = vld [vmem:[%s1453_s6 + $0x60] sm:$0xff]  ;;  %v404_v5 = vld [vmem:[%s1453_s6 + $0x68] sm:$0xff]  ;;  %v469_v6 = vadd.f32 %v1509_v60, %v1503_v54  ;;  %v1519_v7 = vadd.f32 %v402_v58, %v370_v61  ;;  %v310_v10 = vld [vmem:[%s1442_s16 + $0x78] sm:$0xff] }
  0x6f   : > { %467 = vadd.xlane.f32.xlu1 %v466_v59  ;;  %v372_v8 = vadd.f32 %v340_v2, %v308_v63  ;;  %v341_v12 = vld [vmem:[#allocation5 + $0x70] sm:$0xff]  ;;  %v342_v14 = vld [vmem:[#allocation5 + $0x78] sm:$0xff]  ;;  %v311_v23 = vld [vmem:[%s1442_s16 + $0x80] sm:$0xff] }
  0x70   : > { %v1523_v13 = vadd.f32 %v403_v4, %v371_v3  ;;  %v373_v15 = vadd.f32 %v341_v12, %v309_v9  ;;  %v405_v17 = vld [vmem:[%s1453_s6 + $0x70] sm:$0xff]  ;;  %v406_v18 = vld [vmem:[%s1453_s6 + $0x78] sm:$0xff]  ;;  %470 = vadd.xlane.f32.xlu0 %v469_v6  ;;  %v472_v19 = vadd.f32 %v1519_v7, %v1513_v1  ;;  %v374_v22 = vadd.f32 %v342_v14, %v310_v10  ;;  %v312_v24 = vld [vmem:[%s1442_s16 + $0x88] sm:$0xff] }
  0x71   : > { %v1529_v20 = vadd.f32 %v404_v5, %v372_v8  ;;  %v343_v25 = vld [vmem:[#allocation5 + $0x80] sm:$0xff]  ;;  %v344_v28 = vld [vmem:[#allocation5 + $0x88] sm:$0xff]  ;;  %v313_v36 = vld [vmem:[%s1442_s16 + $0x90] sm:$0xff] }
  0x72   : > { %v1533_v26 = vadd.f32 %v405_v17, %v373_v15  ;;  %v375_v29 = vadd.f32 %v343_v25, %v311_v23  ;;  %v407_v30 = vld [vmem:[%s1453_s6 + $0x80] sm:$0xff]  ;;  %v408_v31 = vld [vmem:[%s1453_s6 + $0x88] sm:$0xff]  ;;  %v1539_v34 = vadd.f32 %v406_v18, %v374_v22  ;;  %v376_v35 = vadd.f32 %v344_v28, %v312_v24  ;;  %v314_v37 = vld [vmem:[%s1442_s16 + $0x98] sm:$0xff] }
  0x73   : > { %473 = vadd.xlane.f32.xlu1 %v472_v19  ;;  %v475_v33 = vadd.f32 %v1529_v20, %v1523_v13  ;;  %v345_v39 = vld [vmem:[#allocation5 + $0x90] sm:$0xff]  ;;  %v346_v41 = vld [vmem:[#allocation5 + $0x98] sm:$0xff]  ;;  %v315_v50 = vld [vmem:[%s1442_s16 + $0xa0] sm:$0xff] }
  0x74   : > { %v1543_v40 = vadd.f32 %v407_v30, %v375_v29  ;;  %v377_v42 = vadd.f32 %v345_v39, %v313_v36  ;;  %v409_v44 = vld [vmem:[%s1453_s6 + $0x90] sm:$0xff]  ;;  %v410_v45 = vld [vmem:[%s1453_s6 + $0x98] sm:$0xff]  ;;  %v478_v46 = vadd.f32 %v1539_v34, %v1533_v26  ;;  %v1549_v47 = vadd.f32 %v408_v31, %v376_v35  ;;  %v316_v51 = vld [vmem:[%s1442_s16 + $0xa8] sm:$0xff] }
  0x75   : > { %476 = vadd.xlane.f32.xlu0 %v475_v33  ;;  %v378_v48 = vadd.f32 %v346_v41, %v314_v37  ;;  %v347_v52 = vld [vmem:[#allocation5 + $0xa0] sm:$0xff]  ;;  %v348_v55 = vld [vmem:[#allocation5 + $0xa8] sm:$0xff]  ;;  %v317_v63 = vld [vmem:[%s1442_s16 + $0xb0] sm:$0xff] }
  0x76   : > { %v1553_v53 = vadd.f32 %v409_v44, %v377_v42  ;;  %v379_v56 = vadd.f32 %v347_v52, %v315_v50  ;;  %v411_v57 = vld [vmem:[%s1453_s6 + $0xa0] sm:$0xff]  ;;  %v412_v58 = vld [vmem:[%s1453_s6 + $0xa8] sm:$0xff]  ;;  %v481_v59 = vadd.f32 %v1549_v47, %v1543_v40  ;;  %v380_v62 = vadd.f32 %v348_v55, %v316_v51  ;;  %v318_v0 = vld [vmem:[%s1442_s16 + $0xb8] sm:$0xff] }
  0x77   : > { %479 = vadd.xlane.f32.xlu1 %v478_v46  ;;  %v1559_v61 = vadd.f32 %v410_v45, %v378_v48  ;;  %v349_v2 = vld [vmem:[#allocation5 + $0xb0] sm:$0xff]  ;;  %v350_v4 = vld [vmem:[#allocation5 + $0xb8] sm:$0xff]  ;;  %v319_v14 = vld [vmem:[%s1442_s16 + $0xc0] sm:$0xff] }
  0x78   : > { %v1563_v3 = vadd.f32 %v411_v57, %v379_v56  ;;  %v381_v5 = vadd.f32 %v349_v2, %v317_v63  ;;  %v413_v6 = vld [vmem:[%s1453_s6 + $0xb0] sm:$0xff]  ;;  %v414_v8 = vld [vmem:[%s1453_s6 + $0xb8] sm:$0xff]  ;;  %v1569_v10 = vadd.f32 %v412_v58, %v380_v62  ;;  %v382_v12 = vadd.f32 %v350_v4, %v318_v0  ;;  %v320_v15 = vld [vmem:[%s1442_s16 + $0xc8] sm:$0xff] }
  0x79   : > { %482 = vadd.xlane.f32.xlu0 %v481_v59  ;;  %v484_v9 = vadd.f32 %v1559_v61, %v1553_v53  ;;  %v351_v17 = vld [vmem:[#allocation5 + $0xc0] sm:$0xff]  ;;  %v352_v19 = vld [vmem:[#allocation5 + $0xc8] sm:$0xff]  ;;  %v321_v30 = vld [vmem:[%s1442_s16 + $0xd0] sm:$0xff] }
  0x7a   : > { %v1573_v18 = vadd.f32 %v413_v6, %v381_v5  ;;  %v383_v22 = vadd.f32 %v351_v17, %v319_v14  ;;  %v415_v23 = vld [vmem:[%s1453_s6 + $0xc0] sm:$0xff]  ;;  %v416_v24 = vld [vmem:[%s1453_s6 + $0xc8] sm:$0xff]  ;;  %v487_v25 = vadd.f32 %v1569_v10, %v1563_v3  ;;  %v1579_v28 = vadd.f32 %v414_v8, %v382_v12  ;;  %v322_v31 = vld [vmem:[%s1442_s16 + $0xd8] sm:$0xff] }
  0x7b   : > { %485 = vadd.xlane.f32.xlu1 %v484_v9  ;;  %v384_v29 = vadd.f32 %v352_v19, %v320_v15  ;;  %v353_v33 = vld [vmem:[#allocation5 + $0xd0] sm:$0xff]  ;;  %v354_v36 = vld [vmem:[#allocation5 + $0xd8] sm:$0xff]  ;;  %v323_v46 = vld [vmem:[%s1442_s16 + $0xe0] sm:$0xff] }
  0x7c   : > { %v1583_v35 = vadd.f32 %v415_v23, %v383_v22  ;;  %v385_v37 = vadd.f32 %v353_v33, %v321_v30  ;;  %v417_v39 = vld [vmem:[%s1453_s6 + $0xd0] sm:$0xff]  ;;  %v418_v41 = vld [vmem:[%s1453_s6 + $0xd8] sm:$0xff]  ;;  %v490_v42 = vadd.f32 %v1579_v28, %v1573_v18  ;;  %v386_v45 = vadd.f32 %v354_v36, %v322_v31  ;;  %v324_v48 = vld [vmem:[%s1442_s16 + $0xe8] sm:$0xff] }
  0x7d   : > { %488 = vadd.xlane.f32.xlu0 %v487_v25  ;;  %v1589_v44 = vadd.f32 %v416_v24, %v384_v29  ;;  %v355_v50 = vld [vmem:[#allocation5 + $0xe0] sm:$0xff]  ;;  %v356_v52 = vld [vmem:[#allocation5 + $0xe8] sm:$0xff]  ;;  %v325_v63 = vld [vmem:[%s1442_s16 + $0xf0] sm:$0xff] }
  0x7e   : > { %v1593_v51 = vadd.f32 %v417_v39, %v385_v37  ;;  %v387_v55 = vadd.f32 %v355_v50, %v323_v46  ;;  %v419_v56 = vld [vmem:[%s1453_s6 + $0xe0] sm:$0xff]  ;;  %v420_v57 = vld [vmem:[%s1453_s6 + $0xe8] sm:$0xff]  ;;  %v1599_v59 = vadd.f32 %v418_v41, %v386_v45  ;;  %v388_v62 = vadd.f32 %v356_v52, %v324_v48  ;;  %v326_v0 = vld [vmem:[%s1442_s16 + $0xf8] sm:$0xff]  ;;  %s1158_s16 = scalar_lea.vmem %s1157_s9, 8192 }
  0x7f   : > { %491 = vadd.xlane.f32.xlu1 %v490_v42  ;;  %v493_v58 = vadd.f32 %v1589_v44, %v1583_v35  ;;  %v357_v2 = vld [vmem:[#allocation5 + $0xf0] sm:$0xff]  ;;  %v358_v5 = vld [vmem:[#allocation5 + $0xf8] sm:$0xff]  ;;  %p1160_p5 = scmp.lt.s32.totalorder %s1158_s16, %s1152_s12 }
  0x80   : > { %v1603_v4 = vadd.f32 %v419_v56, %v387_v55  ;;  %v389_v6 = vadd.f32 %v357_v2, %v325_v63  ;;  %v421_v8 = vld [vmem:[%s1453_s6 + $0xf0] sm:$0xff]  ;;  %v422_v9 = vld [vmem:[%s1453_s6 + $0xf8] sm:$0xff]  ;;  %v496_v12 = vadd.f32 %v1599_v59, %v1593_v51  ;;  %v1609_v14 = vadd.f32 %v420_v57, %v388_v62 }
  0x81   : > { %494 = vadd.xlane.f32.xlu0 %v493_v58  ;;  %v390_v15 = vadd.f32 %v358_v5, %v326_v0  ;;  %p1161_p12 = por %p1160_p5, %p1159_p1 }
  0x82   : > { %v1611_v17 = vadd.f32 %v421_v8, %v389_v6  ;;  %v499_v19 = vadd.f32 %v1609_v14, %v1603_v4 }
  0x83   : > { %497 = vadd.xlane.f32.xlu1 %v496_v12  ;;  %v1615_v22 = vadd.f32 %v422_v9, %v390_v15  ;;  %p1162_p2 = pnand %p1161_p12, %p1155_p3 }
  0x85   : > { %500 = vadd.xlane.f32.xlu0 %v499_v19  ;;  %v502_v23 = vadd.f32 %v1615_v22, %v1611_v17 }
  0x87   : > { %503 = vadd.xlane.f32.xlu1 %v502_v23 }
  0xf1   : > { %v459_v24 = vpop.xlane.xlu0 %458 }
  0xf2   : > { %v506_v25 = vmul.f32 0.00390625, %v459_v24 }
  0xf4   : > { %v465_v29 = vpop.xlane.xlu1 %464  ;;  %v1620_v30 = vsub.f32 %v1465_v11, %v506_v25  ;;  %v1623_v31 = vsub.f32 %v1469_v16, %v506_v25 }
  0xf5   : > { %v508_v33 = vmul.f32 0.00390625, %v465_v29  ;;  %v462_v36 = vpop.xlane.xlu0 %461 }
  0xf6   : > { %v507_v41 = vmul.f32 0.00390625, %v462_v36  ;;  %v554_v42 = vmul.f32 %v1620_v30, %v1620_v30  ;;  %v555_v11 = vmul.f32 %v1623_v31, %v1623_v31 }
  0xf7   : > { %v1626_v37 = vsub.f32 %v1473_v21, %v508_v33  ;;  %v1629_v39 = vsub.f32 %v1479_v27, %v508_v33 }
  0xf8   : > { %v468_v45 = vpop.xlane.xlu1 %467  ;;  %v1636_v46 = vsub.f32 %v1483_v32, %v507_v41  ;;  %v1639_v16 = vsub.f32 %v1489_v38, %v507_v41  ;;  %v586_v50 = vadd.f32 %v555_v11, %v554_v42 }
  0xf9   : > { %v509_v48 = vmul.f32 0.00390625, %v468_v45  ;;  %v558_v21 = vmul.f32 %v1626_v37, %v1626_v37  ;;  %v471_v27 = vpop.xlane.xlu0 %470  ;;  %v559_v52 = vmul.f32 %v1629_v39, %v1629_v39 }
  0xfa   : > { %v510_v32 = vmul.f32 0.00390625, %v471_v27  ;;  %v556_v38 = vmul.f32 %v1636_v46, %v1636_v46  ;;  %587 = vadd.xlane.f32.xlu0 %v586_v50  ;;  %v557_v62 = vmul.f32 %v1639_v16, %v1639_v16 }
  0xfb   : > { %v1646_v55 = vsub.f32 %v1493_v43, %v509_v48  ;;  %v1649_v56 = vsub.f32 %v1499_v49, %v509_v48  ;;  %v592_v58 = vadd.f32 %v559_v52, %v558_v21 }
  0xfc   : > { %v474_v57 = vpop.xlane.xlu1 %473  ;;  %v1656_v63 = vsub.f32 %v1503_v54, %v510_v32  ;;  %v1659_v0 = vsub.f32 %v1509_v60, %v510_v32  ;;  %v589_v5 = vadd.f32 %v557_v62, %v556_v38 }
  0xfd   : > { %v511_v43 = vmul.f32 0.00390625, %v474_v57  ;;  %v560_v49 = vmul.f32 %v1646_v55, %v1646_v55  ;;  %v561_v6 = vmul.f32 %v1649_v56, %v1649_v56 }
  0xfe   : > { %v477_v2 = vpop.xlane.xlu0 %476  ;;  %v562_v60 = vmul.f32 %v1656_v63, %v1656_v63  ;;  %593 = vadd.xlane.f32.xlu0 %v592_v58  ;;  %590 = vadd.xlane.f32.xlu1 %v589_v5  ;;  %v563_v19 = vmul.f32 %v1659_v0, %v1659_v0 }
  0xff   : > { %v1666_v8 = vsub.f32 %v1513_v1, %v511_v43  ;;  %v1669_v9 = vsub.f32 %v1519_v7, %v511_v43  ;;  %v512_v54 = vmul.f32 0.00390625, %v477_v2  ;;  %v595_v15 = vadd.f32 %v561_v6, %v560_v49 }
 0x100   : > { %v480_v12 = vpop.xlane.xlu1 %479  ;;  %v598_v29 = vadd.f32 %v563_v19, %v562_v60 }
 0x101   : > { %v1676_v23 = vsub.f32 %v1523_v13, %v512_v54  ;;  %v1679_v1 = vsub.f32 %v1529_v20, %v512_v54  ;;  %v513_v24 = vmul.f32 0.00390625, %v480_v12  ;;  %v564_v7 = vmul.f32 %v1666_v8, %v1666_v8 }
 0x102   : > { %v483_v25 = vpop.xlane.xlu0 %482  ;;  %v565_v33 = vmul.f32 %v1669_v9, %v1669_v9  ;;  %596 = vadd.xlane.f32.xlu1 %v595_v15  ;;  %599 = vadd.xlane.f32.xlu0 %v598_v29 }
 0x103   : > { %v1686_v36 = vsub.f32 %v1533_v26, %v513_v24  ;;  %v1689_v41 = vsub.f32 %v1539_v34, %v513_v24  ;;  %v514_v13 = vmul.f32 0.00390625, %v483_v25  ;;  %v566_v20 = vmul.f32 %v1676_v23, %v1676_v23 }
 0x104   : > { %v486_v42 = vpop.xlane.xlu1 %485  ;;  %v601_v45 = vadd.f32 %v565_v33, %v564_v7  ;;  %v567_v11 = vmul.f32 %v1679_v1, %v1679_v1 }
 0x105   : > { %v1696_v48 = vsub.f32 %v1543_v40, %v514_v13  ;;  %v1699_v26 = vsub.f32 %v1549_v47, %v514_v13  ;;  %v515_v21 = vmul.f32 0.00390625, %v486_v42  ;;  %v568_v34 = vmul.f32 %v1686_v36, %v1686_v36 }
 0x106   : > { %v489_v27 = vpop.xlane.xlu0 %488  ;;  %v604_v50 = vadd.f32 %v567_v11, %v566_v20  ;;  %v569_v52 = vmul.f32 %v1689_v41, %v1689_v41  ;;  %602 = vadd.xlane.f32.xlu1 %v601_v45 }
 0x107   : > { %v1706_v32 = vsub.f32 %v1553_v53, %v515_v21  ;;  %v1709_v38 = vsub.f32 %v1559_v61, %v515_v21  ;;  %v516_v40 = vmul.f32 0.00390625, %v489_v27  ;;  %v570_v47 = vmul.f32 %v1696_v48, %v1696_v48 }
 0x108   : > { %605 = vadd.xlane.f32.xlu0 %v604_v50  ;;  %v492_v57 = vpop.xlane.xlu1 %491  ;;  %v607_v58 = vadd.f32 %v569_v52, %v568_v34  ;;  %v571_v62 = vmul.f32 %v1699_v26, %v1699_v26 }
 0x109   : > { %v1716_v43 = vsub.f32 %v1563_v3, %v516_v40  ;;  %v1719_v53 = vsub.f32 %v1569_v10, %v516_v40  ;;  %v517_v49 = vmul.f32 0.00390625, %v492_v57  ;;  %v572_v61 = vmul.f32 %v1706_v32, %v1706_v32 }
 0x10a   : > { %v495_v2 = vpop.xlane.xlu0 %494  ;;  %v610_v5 = vadd.f32 %v571_v62, %v570_v47  ;;  %v573_v6 = vmul.f32 %v1709_v38, %v1709_v38  ;;  %608 = vadd.xlane.f32.xlu1 %v607_v58 }
 0x10b   : > { %v1726_v54 = vsub.f32 %v1573_v18, %v517_v49  ;;  %v1729_v60 = vsub.f32 %v1579_v28, %v517_v49  ;;  %v518_v3 = vmul.f32 0.00390625, %v495_v2  ;;  %v574_v10 = vmul.f32 %v1716_v43, %v1716_v43 }
 0x10c   : > { %611 = vadd.xlane.f32.xlu0 %v610_v5  ;;  %v498_v12 = vpop.xlane.xlu1 %497  ;;  %v613_v15 = vadd.f32 %v573_v6, %v572_v61  ;;  %v575_v19 = vmul.f32 %v1719_v53, %v1719_v53  ;;  %v715_v2 = vlaneseq }
 0x10d   : > { %v1736_v24 = vsub.f32 %v1583_v35, %v518_v3  ;;  %v1739_v18 = vsub.f32 %v1589_v44, %v518_v3  ;;  %v519_v7 = vmul.f32 0.00390625, %v498_v12  ;;  %v576_v28 = vmul.f32 %v1726_v54, %v1726_v54 }
 0x10e   : > { %v501_v25 = vpop.xlane.xlu0 %500  ;;  %v616_v29 = vadd.f32 %v575_v19, %v574_v10  ;;  %v577_v33 = vmul.f32 %v1729_v60, %v1729_v60  ;;  %614 = vadd.xlane.f32.xlu1 %v613_v15  ;;  %v716_v19 = vshrl.u32 %v715_v2, 7 }
 0x10f   : > { %v1746_v13 = vsub.f32 %v1593_v51, %v519_v7  ;;  %v1749_v20 = vsub.f32 %v1599_v59, %v519_v7  ;;  %v520_v35 = vmul.f32 0.00390625, %v501_v25  ;;  %v578_v44 = vmul.f32 %v1736_v24, %v1736_v24 }
 0x110   : > { %617 = vadd.xlane.f32.xlu0 %v616_v29  ;;  %v504_v42 = vpop.xlane.xlu1 %503  ;;  %v619_v45 = vadd.f32 %v577_v33, %v576_v28  ;;  %v579_v11 = vmul.f32 %v1739_v18, %v1739_v18 }
 0x111   : > { %v1756_v21 = vsub.f32 %v1603_v4, %v520_v35  ;;  %v1759_v51 = vsub.f32 %v1609_v14, %v520_v35  ;;  %v521_v34 = vmul.f32 0.00390625, %v504_v42  ;;  %v580_v59 = vmul.f32 %v1746_v13, %v1746_v13 }
 0x112   : > { %v622_v27 = vadd.f32 %v579_v11, %v578_v44  ;;  %v581_v50 = vmul.f32 %v1749_v20, %v1749_v20  ;;  %620 = vadd.xlane.f32.xlu1 %v619_v45  ;;  %v717_v44 = vsub.s32 0, %v716_v19  ;;  %v455_v11 = vld [vmem:[%s1979_s3] sm:$0x3] }
 0x113   : > { %v1766_v52 = vsub.f32 %v1611_v17, %v521_v34  ;;  %v1769_v40 = vsub.f32 %v1615_v22, %v521_v34  ;;  %v582_v4 = vmul.f32 %v1756_v21, %v1756_v21  ;;  %v583_v14 = vmul.f32 %v1759_v51, %v1759_v51 }
 0x114   : > { %623 = vadd.xlane.f32.xlu0 %v622_v27  ;;  %v625_v47 = vadd.f32 %v581_v50, %v580_v59  ;;  %v721_v34 = vsub.s32 1, %v716_v19  ;;  %v456_v50 = vld [vmem:[%s1980_s4] sm:$0x3] }
 0x115   : > { %v628_v57 = vadd.f32 %v583_v14, %v582_v4  ;;  %v584_v58 = vmul.f32 %v1766_v52, %v1766_v52  ;;  %v585_v17 = vmul.f32 %v1769_v40, %v1769_v40 }
 0x116   : > { %626 = vadd.xlane.f32.xlu1 %v625_v47  ;;  %v1785_v47 = vrot.slane %v455_v11, %v717_v44  ;;  %v1791_v2 = vrot.slane %v456_v50, %v721_v34 }
 0x117   : > { %v631_v22 = vadd.f32 %v585_v17, %v584_v58  ;;  %v1787_v17 = vrot.slane %v455_v11, %v721_v34 }
 0x118   : > { %629 = vadd.xlane.f32.xlu0 %v628_v57 }
 0x11a   : > { %632 = vadd.xlane.f32.xlu1 %v631_v22 }
 0x183   : > { %v588_v62 = vpop.xlane.xlu0 %587 }
 0x184   : > { %v634_v49 = vmul.f32 0.00390625, %v588_v62 }
 0x186   : > { %v650_v61 = vadd.f32 1e-12, %v634_v49 }
 0x187   : > { %v591_v5 = vpop.xlane.xlu1 %590  ;;  %v594_v6 = vpop.xlane.xlu0 %593 }
 0x188   : > { %1038 = vrsqrt.f32 %v650_v61  ;;  %v635_v3 = vmul.f32 0.00390625, %v591_v5  ;;  %v636_v10 = vmul.f32 0.00390625, %v594_v6  ;;  %v1789_v61 = vrot.slane %v456_v50, %v717_v44 }
 0x18a   : > { %v651_v12 = vadd.f32 1e-12, %v635_v3  ;;  %v652_v15 = vadd.f32 1e-12, %v636_v10 }
 0x18b   : > { %v597_v7 = vpop.xlane.xlu1 %596  ;;  %v600_v28 = vpop.xlane.xlu0 %599 }
 0x18c   : > { %1040 = vrsqrt.f32 %v651_v12  ;;  %v637_v25 = vmul.f32 0.00390625, %v597_v7  ;;  %v638_v29 = vmul.f32 0.00390625, %v600_v28 }
 0x18d   : > { %1042 = vrsqrt.f32 %v652_v15 }
 0x18e   : > { %v653_v33 = vadd.f32 1e-12, %v637_v25  ;;  %v654_v35 = vadd.f32 1e-12, %v638_v29 }
 0x18f   : > { %v603_v42 = vpop.xlane.xlu1 %602 }
 0x190   : > { %1044 = vrsqrt.f32 %v653_v33  ;;  %v639_v59 = vmul.f32 0.00390625, %v603_v42 }
 0x191   : > { %v606_v45 = vpop.xlane.xlu0 %605  ;;  %1046 = vrsqrt.f32 %v654_v35 }
 0x192   : > { %v640_v27 = vmul.f32 0.00390625, %v606_v45  ;;  %v655_v4 = vadd.f32 1e-12, %v639_v59 }
 0x193   : > { %v609_v57 = vpop.xlane.xlu1 %608 }
 0x194   : > { %v656_v14 = vadd.f32 1e-12, %v640_v27  ;;  %1048 = vrsqrt.f32 %v655_v4  ;;  %v641_v22 = vmul.f32 0.00390625, %v609_v57 }
 0x195   : > { %v612_v58 = vpop.xlane.xlu0 %611  ;;  %v1039_v49 = vpop.eup %1038 }
 0x196   : > { %v642_v62 = vmul.f32 0.00390625, %v612_v58  ;;  %1050 = vrsqrt.f32 %v656_v14  ;;  %v682_v5 = vmul.f32 %v1039_v49, %v1620_v30  ;;  %v683_v6 = vmul.f32 %v1039_v49, %v1623_v31 }
 0x197   : > { %v657_v3 = vadd.f32 1e-12, %v641_v22  ;;  %v615_v12 = vpop.xlane.xlu1 %614 }
 0x198   : > { %v658_v10 = vadd.f32 1e-12, %v642_v62  ;;  %v725_v19 = vmul.f32 %v1785_v47, %v682_v5  ;;  %v726_v7 = vmul.f32 %v1787_v17, %v683_v6  ;;  %v643_v28 = vmul.f32 0.00390625, %v615_v12 }
 0x199   : > { %v618_v15 = vpop.xlane.xlu0 %617  ;;  %1052 = vrsqrt.f32 %v657_v3  ;;  %v1041_v25 = vpop.eup %1040 }
 0x19a   : > { %1054 = vrsqrt.f32 %v658_v10  ;;  %v644_v29 = vmul.f32 0.00390625, %v618_v15  ;;  %v1043_v33 = vpop.eup %1042  ;;  %v768_v35 = vadd.f32 %v1789_v61, %v725_v19  ;;  %v769_v30 = vadd.f32 %v1791_v2, %v726_v7 }
 0x19b   : > { %v684_v31 = vmul.f32 %v1041_v25, %v1636_v46  ;;  %v685_v44 = vmul.f32 %v1041_v25, %v1639_v16  ;;  %v686_v42 = vmul.f32 %v1043_v33, %v1626_v37  ;;  %v687_v45 = vmul.f32 %v1043_v33, %v1629_v39  ;;  %v621_v34 = vpop.xlane.xlu1 %620 }
 0x19c   : > { %v659_v11 = vadd.f32 1e-12, %v643_v28  ;;  %800 = vst [vmem:[%s1804_s29] sm:$0xff] %v768_v35  ;;  %801 = vst [vmem:[%s1804_s29 + $0x8] sm:$0xff] %v769_v30  ;;  %v660_v46 = vadd.f32 1e-12, %v644_v29  ;;  %v645_v4 = vmul.f32 0.00390625, %v621_v34 }
 0x19d   : > { %v624_v59 = vpop.xlane.xlu0 %623  ;;  %v727_v27 = vmul.f32 %v1785_v47, %v684_v31  ;;  %v728_v50 = vmul.f32 %v1787_v17, %v685_v44  ;;  %v1045_v16 = vpop.eup %1044  ;;  %v729_v37 = vmul.f32 %v1785_v47, %v686_v42  ;;  %v730_v39 = vmul.f32 %v1787_v17, %v687_v45 }
 0x19e   : > { %1056 = vrsqrt.f32 %v659_v11  ;;  %v646_v14 = vmul.f32 0.00390625, %v624_v59  ;;  %v1047_v57 = vpop.eup %1046  ;;  %v688_v62 = vmul.f32 %v1045_v16, %v1646_v55  ;;  %v689_v49 = vmul.f32 %v1045_v16, %v1649_v56 }
 0x19f   : > { %v770_v58 = vadd.f32 %v1789_v61, %v727_v27  ;;  %v771_v22 = vadd.f32 %v1791_v2, %v728_v50  ;;  %v772_v5 = vadd.f32 %v1789_v61, %v729_v37  ;;  %v773_v6 = vadd.f32 %v1791_v2, %v730_v39  ;;  %v627_v12 = vpop.xlane.xlu1 %626 }
 0x1a0   : > { %v690_v3 = vmul.f32 %v1047_v57, %v1656_v63  ;;  %v691_v10 = vmul.f32 %v1047_v57, %v1659_v0  ;;  %v731_v15 = vmul.f32 %v1785_v47, %v688_v62  ;;  %v732_v19 = vmul.f32 %v1787_v17, %v689_v49 }
 0x1a1   : > { %802 = vst [vmem:[%s1804_s29 + $0x10] sm:$0xff] %v770_v58  ;;  %803 = vst [vmem:[%s1804_s29 + $0x18] sm:$0xff] %v771_v22  ;;  %1058 = vrsqrt.f32 %v660_v46  ;;  %v661_v7 = vadd.f32 1e-12, %v645_v4  ;;  %v1049_v55 = vpop.eup %1048  ;;  %v662_v28 = vadd.f32 1e-12, %v646_v14  ;;  %v630_v31 = vpop.xlane.xlu0 %629 }
 0x1a2   : > { %804 = vst [vmem:[%s1804_s29 + $0x20] sm:$0xff] %v772_v5  ;;  %805 = vst [vmem:[%s1804_s29 + $0x28] sm:$0xff] %v773_v6  ;;  %v733_v56 = vmul.f32 %v1785_v47, %v690_v3  ;;  %v734_v63 = vmul.f32 %v1787_v17, %v691_v10  ;;  %v647_v0 = vmul.f32 0.00390625, %v627_v12  ;;  %v774_v29 = vadd.f32 %v1789_v61, %v731_v15 }
 0x1a3   : > { %v1051_v25 = vpop.eup %1050  ;;  %v775_v33 = vadd.f32 %v1791_v2, %v732_v19  ;;  %v692_v35 = vmul.f32 %v1049_v55, %v1666_v8  ;;  %v693_v30 = vmul.f32 %v1049_v55, %v1669_v9  ;;  %1060 = vrsqrt.f32 %v661_v7  ;;  %v633_v39 = vpop.xlane.xlu1 %632 }
 0x1a4   : > { %v776_v44 = vadd.f32 %v1789_v61, %v733_v56  ;;  %v777_v42 = vadd.f32 %v1791_v2, %v734_v63  ;;  %v694_v45 = vmul.f32 %v1051_v25, %v1676_v23  ;;  %v695_v11 = vmul.f32 %v1051_v25, %v1679_v1  ;;  %806 = vst [vmem:[%s1804_s29 + $0x30] sm:$0xff] %v774_v29 }
 0x1a5   : > { %807 = vst [vmem:[%s1804_s29 + $0x38] sm:$0xff] %v775_v33  ;;  %v735_v34 = vmul.f32 %v1785_v47, %v692_v35  ;;  %v736_v59 = vmul.f32 %v1787_v17, %v693_v30  ;;  %v663_v27 = vadd.f32 1e-12, %v647_v0  ;;  %1062 = vrsqrt.f32 %v662_v28 }
 0x1a6   : > { %v1053_v8 = vpop.eup %1052  ;;  %808 = vst [vmem:[%s1804_s29 + $0x40] sm:$0xff] %v776_v44  ;;  %809 = vst [vmem:[%s1804_s29 + $0x48] sm:$0xff] %v777_v42  ;;  %v737_v9 = vmul.f32 %v1785_v47, %v694_v45  ;;  %v738_v50 = vmul.f32 %v1787_v17, %v695_v11  ;;  %v648_v23 = vmul.f32 0.00390625, %v630_v31  ;;  %v649_v5 = vmul.f32 0.00390625, %v633_v39 }
 0x1a7   : > { %v1055_v1 = vpop.eup %1054  ;;  %v778_v46 = vadd.f32 %v1789_v61, %v735_v34  ;;  %v779_v4 = vadd.f32 %v1791_v2, %v736_v59  ;;  %v696_v16 = vmul.f32 %v1053_v8, %v1686_v36  ;;  %v697_v37 = vmul.f32 %v1053_v8, %v1689_v41 }
 0x1a8   : > { %v780_v14 = vadd.f32 %v1789_v61, %v737_v9  ;;  %v781_v57 = vadd.f32 %v1791_v2, %v738_v50  ;;  %v698_v58 = vmul.f32 %v1055_v1, %v1696_v48  ;;  %v699_v22 = vmul.f32 %v1055_v1, %v1699_v26 }
 0x1a9   : > { %810 = vst [vmem:[%s1804_s29 + $0x50] sm:$0xff] %v778_v46  ;;  %811 = vst [vmem:[%s1804_s29 + $0x58] sm:$0xff] %v779_v4  ;;  %v739_v62 = vmul.f32 %v1785_v47, %v696_v16  ;;  %v740_v49 = vmul.f32 %v1787_v17, %v697_v37  ;;  %1064 = vrsqrt.f32 %v663_v27  ;;  %v664_v36 = vadd.f32 1e-12, %v648_v23 }
 0x1aa   : > { %812 = vst [vmem:[%s1804_s29 + $0x60] sm:$0xff] %v780_v14  ;;  %813 = vst [vmem:[%s1804_s29 + $0x68] sm:$0xff] %v781_v57  ;;  %v741_v41 = vmul.f32 %v1785_v47, %v698_v58  ;;  %v742_v48 = vmul.f32 %v1787_v17, %v699_v22  ;;  %v665_v7 = vadd.f32 1e-12, %v649_v5 }
 0x1ab   : > { %v1057_v26 = vpop.eup %1056  ;;  %v782_v6 = vadd.f32 %v1789_v61, %v739_v62  ;;  %v783_v3 = vadd.f32 %v1791_v2, %v740_v49  ;;  %1066 = vrsqrt.f32 %v664_v36 }
 0x1ac   : > { %v784_v10 = vadd.f32 %v1789_v61, %v741_v41  ;;  %v785_v12 = vadd.f32 %v1791_v2, %v742_v48  ;;  %v700_v15 = vmul.f32 %v1057_v26, %v1706_v32  ;;  %v701_v19 = vmul.f32 %v1057_v26, %v1709_v38 }
 0x1ad   : > { %814 = vst [vmem:[%s1804_s29 + $0x70] sm:$0xff] %v782_v6  ;;  %815 = vst [vmem:[%s1804_s29 + $0x78] sm:$0xff] %v783_v3  ;;  %1068 = vrsqrt.f32 %v665_v7 }
 0x1ae   : > { %v1059_v55 = vpop.eup %1058  ;;  %816 = vst [vmem:[%s1804_s29 + $0x80] sm:$0xff] %v784_v10  ;;  %817 = vst [vmem:[%s1804_s29 + $0x88] sm:$0xff] %v785_v12  ;;  %v743_v56 = vmul.f32 %v1785_v47, %v700_v15  ;;  %v744_v63 = vmul.f32 %v1787_v17, %v701_v19 }
 0x1af   : > { %v702_v28 = vmul.f32 %v1059_v55, %v1716_v43  ;;  %v703_v0 = vmul.f32 %v1059_v55, %v1719_v53 }
 0x1b0   : > { %v786_v32 = vadd.f32 %v1789_v61, %v743_v56  ;;  %v787_v38 = vadd.f32 %v1791_v2, %v744_v63  ;;  %v1061_v33 = vpop.eup %1060 }
 0x1b1   : > { %v745_v25 = vmul.f32 %v1785_v47, %v702_v28  ;;  %v746_v29 = vmul.f32 %v1787_v17, %v703_v0  ;;  %v704_v53 = vmul.f32 %v1061_v33, %v1726_v54  ;;  %v705_v31 = vmul.f32 %v1061_v33, %v1729_v60 }
 0x1b2   : > { %818 = vst [vmem:[%s1804_s29 + $0x90] sm:$0xff] %v786_v32  ;;  %819 = vst [vmem:[%s1804_s29 + $0x98] sm:$0xff] %v787_v38  ;;  %v1063_v35 = vpop.eup %1062 }
 0x1b3   : > { %v788_v30 = vadd.f32 %v1789_v61, %v745_v25  ;;  %v789_v43 = vadd.f32 %v1791_v2, %v746_v29  ;;  %v706_v44 = vmul.f32 %v1063_v35, %v1736_v24  ;;  %v707_v42 = vmul.f32 %v1063_v35, %v1739_v18 }
 0x1b4   : > { %v747_v45 = vmul.f32 %v1785_v47, %v704_v53  ;;  %v748_v11 = vmul.f32 %v1787_v17, %v705_v31 }
 0x1b5   : > { %820 = vst [vmem:[%s1804_s29 + $0xa0] sm:$0xff] %v788_v30  ;;  %821 = vst [vmem:[%s1804_s29 + $0xa8] sm:$0xff] %v789_v43  ;;  %v749_v59 = vmul.f32 %v1785_v47, %v706_v44  ;;  %v750_v54 = vmul.f32 %v1787_v17, %v707_v42 }
 0x1b6   : > { %v1065_v34 = vpop.eup %1064  ;;  %v790_v60 = vadd.f32 %v1789_v61, %v747_v45  ;;  %v791_v24 = vadd.f32 %v1791_v2, %v748_v11 }
 0x1b7   : > { %v708_v18 = vmul.f32 %v1065_v34, %v1746_v13  ;;  %v709_v27 = vmul.f32 %v1065_v34, %v1749_v20  ;;  %v792_v9 = vadd.f32 %v1789_v61, %v749_v59  ;;  %v793_v50 = vadd.f32 %v1791_v2, %v750_v54 }
 0x1b8   : > { %v1067_v8 = vpop.eup %1066  ;;  %822 = vst [vmem:[%s1804_s29 + $0xb0] sm:$0xff] %v790_v60  ;;  %823 = vst [vmem:[%s1804_s29 + $0xb8] sm:$0xff] %v791_v24 }
 0x1b9   : > { %v751_v23 = vmul.f32 %v1785_v47, %v708_v18  ;;  %v752_v1 = vmul.f32 %v1787_v17, %v709_v27  ;;  %v710_v46 = vmul.f32 %v1067_v8, %v1756_v21  ;;  %v711_v13 = vmul.f32 %v1067_v8, %v1759_v51  ;;  %824 = vst [vmem:[%s1804_s29 + $0xc0] sm:$0xff] %v792_v9 }
 0x1ba   : > { %825 = vst [vmem:[%s1804_s29 + $0xc8] sm:$0xff] %v793_v50  ;;  %v1069_v39 = vpop.eup %1068 }
 0x1bb   : > { %v794_v20 = vadd.f32 %v1789_v61, %v751_v23  ;;  %v795_v4 = vadd.f32 %v1791_v2, %v752_v1  ;;  %v753_v16 = vmul.f32 %v1785_v47, %v710_v46  ;;  %v754_v37 = vmul.f32 %v1787_v17, %v711_v13 }
 0x1bc   : > { %v712_v14 = vmul.f32 %v1069_v39, %v1766_v52  ;;  %v713_v57 = vmul.f32 %v1069_v39, %v1769_v40 }
 0x1bd   : > { %826 = vst [vmem:[%s1804_s29 + $0xd0] sm:$0xff] %v794_v20  ;;  %827 = vst [vmem:[%s1804_s29 + $0xd8] sm:$0xff] %v795_v4  ;;  %v796_v21 = vadd.f32 %v1789_v61, %v753_v16  ;;  %v797_v51 = vadd.f32 %v1791_v2, %v754_v37 }
 0x1be   : > { %v755_v58 = vmul.f32 %v1785_v47, %v712_v14  ;;  %v756_v22 = vmul.f32 %v1787_v17, %v713_v57 }
 0x1bf   : > { %828 = vst [vmem:[%s1804_s29 + $0xe0] sm:$0xff] %v796_v21  ;;  %829 = vst [vmem:[%s1804_s29 + $0xe8] sm:$0xff] %v797_v51 }
 0x1c0   : > { %v798_v52 = vadd.f32 %v1789_v61, %v755_v58  ;;  %v799_v40 = vadd.f32 %v1791_v2, %v756_v22 }
 0x1c2   : > { %830 = vst [vmem:[%s1804_s29 + $0xf0] sm:$0xff] %v798_v52  ;;  %831 = vst [vmem:[%s1804_s29 + $0xf8] sm:$0xff] %v799_v40 }
 0x1c3   : > { %1165 = shalt.err (!%p1162_p2)
}
 0x1c4   : > { %s1166_s17 = scalar_lea.hbm %s1925_s11, 4096  ;;  %s1170_s23 = scalar_lea.hbm %s1981_s5, 8192 }
 0x1c5   : > { %p1167_p7 = scmp.ne.s32.totalorder %s1925_s11, %s1166_s17  ;;  %p1171_p6 = scmp.lt.s32.totalorder %s1925_s11, %s1981_s5 }
 0x1c6   : > { %p1172_p0 = scmp.lt.s32.totalorder %s1170_s23, %s1166_s17 }
 0x1c7   : > { %p1168_p11 = pnand %p1167_p7, %p1998_p10 }
 0x1c8   : > { %p1173_p13 = por %p1172_p0, %p1171_p6 }
 0x1c9   : > { %p1169_p4 = pneg %p1168_p11 }
 0x1cb   : > { %p1174_p8 = pnand %p1173_p13, %p1169_p4 }
 0x1cd   : > { %1177 = shalt.err (!%p1174_p8)
}
 0x1ce   : > { %s1232_s29 = smov 256   ;;  %s1233_s8 = smov 16  }
 0x1cf   : > { %980 = dma.vmem_to_hbm [thread:$0]  (%p1998_p10), %s1927_s27, 4096, %s1925_s11, %s1935_s13, %s1232_s29, %s1232_s29, %s1233_s8  }
 0x1d0 PF: > { %s861_s30 = sand.u32 1, %s1212_s18   ;;  %p1999_p9 = scmp.ne.s32.totalorder %s1990_s7, 0 }
 0x1d1   : > { %p2000_p3 = scmp.ge.s32.totalorder %s1224_s21, 2  ;;  %s862_s10 = scalar_lea.sflag [#allocation4], %s861_s30 }
 0x1d3   : > { %p994_p1 = pnand %p2000_p3, %p1999_p9 }
 0x1d5   : > { %p995_p5 = pneg %p994_p1 }
 0x1d7   : > { %1207 = dma.done.wait (%p995_p5), %s862_s10, 4096  }
 0x1d8   : > { %1209 = vsyncadd (%p995_p5), %s862_s10, 4294963200  ;;  %p19_p12 = scmp.ge.s32.totalorder %s1285_s22, 4   ;;  %s2001_s18 = smov %s1216_s19 }
 0x1d9   : > { %s2002_s19 = smov %s1220_s20  ;;  %s2003_s20 = smov %s1294_s25 }
 0x1da   : > { %s2004_s21 = smov %s1285_s22  ;;  %21 = sbr.rel (!%p19_p12) target bundleno = 6 (0x6), region = 100 }
 0x1df   :  { %867 = vsyncpa [#allocation3], 1 }
 0x1e0   :  { %869 = vsyncpa [#allocation3 + $0x1], 1 }
 0x1e1   :  { %870 = vsyncpa [#allocation6], 1 }
 0x1e2   :  { %871 = vsyncpa [#allocation4], 1 }
 0x1e3   :  { %873 = vsyncpa [#allocation4 + $0x1], 1 }

</bundles_post_ra>
